<compile_context>
chip_gen: v6e
topology: v6e:2x2x1
jax: 0.10.0
libtpu: 0.0.40
codegen_flags: <defaults>
</compile_context>

<pallas_src>
import jax
import jax.numpy as jnp
from jax.experimental import pallas as pl
from jax.experimental.pallas import tpu as pltpu


HIDDEN = 256
LANE = 128
MIN_TILE = 16          # bf16-friendly sublane packing


def _round_up(n, m):
    return ((n + m - 1) // m) * m


def _cdiv(a, b):
    return -(-a // b)


def critic_kernel(x_ref, a_ref, w1_ref, b1_ref, w2h_ref, w2a_ref, b2_ref,
                  w3_ref, b3_ref, o_ref):
    cd = w1_ref.dtype                       # compute dtype (bf16 or f32)
    x = x_ref[...].astype(cd)               # (tile, state_dim)
    a = a_ref[...].astype(cd)               # (tile, action_dim)

    # fc1: relu(x @ W1 + b1), f32 accumulation.
    h1 = jnp.dot(x, w1_ref[...], preferred_element_type=jnp.float32)
    h1 = jnp.maximum(h1 + b1_ref[...], 0.0)

    # fc2 on cat([h1, a]) == h1 @ W2[:256] + a @ W2[256:], + b2, relu.
    h2 = jnp.dot(h1.astype(cd), w2h_ref[...],
                 preferred_element_type=jnp.float32)
    h2 = h2 + jnp.dot(a, w2a_ref[...], preferred_element_type=jnp.float32)
    h2 = jnp.maximum(h2 + b2_ref[...], 0.0)

    # fc3 (no activation); output lanes zero-padded to 128 -> unmasked store.
    q = jnp.dot(h2.astype(cd), w3_ref[...],
                preferred_element_type=jnp.float32)
    o_ref[...] = (q + b3_ref[...]).astype(o_ref.dtype)


def prepare_params(params, *, compute_dtype=jnp.bfloat16):
    """One-time packing of the Critic weights for the Pallas kernel.

    Splits W2 into its h1/action halves, lane-pads W3/b3 to 128 output lanes
    and casts MXU operands to `compute_dtype`.  Call once, reuse per forward.
    """
    w1 = params["w1"]                       # (state_dim, 256)
    w2 = params["w2"]                       # (256 + action_dim, 256)
    w3 = params["w3"]                       # (256, action_dim)
    action_dim = w3.shape[1]
    out_pad = _round_up(action_dim, LANE)

    w3p = jnp.zeros((HIDDEN, out_pad), jnp.float32)
    w3p = w3p.at[:, :action_dim].set(w3.astype(jnp.float32))
    b3p = jnp.zeros((1, out_pad), jnp.float32)
    b3p = b3p.at[:, :action_dim].set(
        params["b3"].reshape(1, -1).astype(jnp.float32))

    return dict(
        w1=w1.astype(compute_dtype),
        b1=params["b1"].reshape(1, HIDDEN).astype(jnp.float32),
        w2h=w2[:HIDDEN, :].astype(compute_dtype),
        w2a=w2[HIDDEN:, :].astype(compute_dtype),
        b2=params["b2"].reshape(1, HIDDEN).astype(jnp.float32),
        w3p=w3p.astype(compute_dtype),
        b3p=b3p,
    )


def critic_forward(x, a, prep, *, batch_tile=512, out_dtype=None):
    """x: (B, state_dim), a: (B, action_dim) -> (B, action_dim).

    `prep` is the output of prepare_params().  Output dtype defaults to the
    compute dtype (bf16 by default) so the 128-lane writeback slab is half
    the size; pass out_dtype=jnp.float32 for a full-precision result.
    """
    B, state_dim = x.shape
    action_dim = a.shape[1]
    out_pad = prep["w3p"].shape[1]
    cd = prep["w1"].dtype
    if out_dtype is None:
        out_dtype = cd

    assert prep["w1"].shape == (state_dim, HIDDEN)
    assert prep["w2a"].shape == (action_dim, HIDDEN)

    # Adaptive batch tiling: minimize padded waste, keep >= 2 grid steps when
    # the batch allows (v7x megacore), keep the tile a multiple of 16.
    n_steps = max(_cdiv(B, batch_tile), min(2, _cdiv(B, MIN_TILE)))
    tile = _round_up(_cdiv(B, n_steps), MIN_TILE)
    b_pad = _round_up(B, tile)
    grid_n = b_pad // tile

    if b_pad != B:
        x = jnp.pad(x, ((0, b_pad - B), (0, 0)))
        a = jnp.pad(a, ((0, b_pad - B), (0, 0)))

    full = lambda i: (0, 0)       # resident weights / biases
    batched = lambda i: (i, 0)    # batch-tiled arrays

    flops = 2 * b_pad * (state_dim * HIDDEN + action_dim * HIDDEN
                         + HIDDEN * HIDDEN + HIDDEN * out_pad)
    bytes_accessed = (x.size * x.dtype.itemsize
                      + a.size * a.dtype.itemsize
                      + sum(prep[k].size * prep[k].dtype.itemsize
                            for k in ("w1", "b1", "w2h", "w2a", "b2",
                                      "w3p", "b3p"))
                      + b_pad * out_pad * jnp.dtype(out_dtype).itemsize)

    compiler_kwargs = dict(dimension_semantics=("parallel",))
    if tile >= 2048:
        # Headroom for very large batch tiles (still < v7x's 64 MiB VMEM).
        compiler_kwargs["vmem_limit_bytes"] = 48 * 1024 * 1024

    out = pl.pallas_call(
        critic_kernel,
        out_shape=jax.ShapeDtypeStruct((b_pad, out_pad), out_dtype),
        grid=(grid_n,),
        in_specs=[
            pl.BlockSpec((tile, state_dim), batched),    # x
            pl.BlockSpec((tile, action_dim), batched),   # a
            pl.BlockSpec((state_dim, HIDDEN), full),     # W1
            pl.BlockSpec((1, HIDDEN), full),             # b1
            pl.BlockSpec((HIDDEN, HIDDEN), full),        # W2[:256]
            pl.BlockSpec((action_dim, HIDDEN), full),    # W2[256:]
            pl.BlockSpec((1, HIDDEN), full),             # b2
            pl.BlockSpec((HIDDEN, out_pad), full),       # W3 (lane-padded)
            pl.BlockSpec((1, out_pad), full),            # b3 (lane-padded)
        ],
        out_specs=pl.BlockSpec((tile, out_pad), batched),
        compiler_params=pltpu.CompilerParams(**compiler_kwargs),
        cost_estimate=pl.CostEstimate(flops=flops, transcendentals=0,
                                      bytes_accessed=bytes_accessed),
    )(x, a, prep["w1"], prep["b1"], prep["w2h"], prep["w2a"], prep["b2"],
      prep["w3p"], prep["b3p"])

    return out[:B, :action_dim]


def init_params(key, state_dim, action_dim):
    """PyTorch-style uniform(-1/sqrt(fan_in), 1/sqrt(fan_in)) init.

    Weights are stored as (in_features, out_features)."""
    ks = jax.random.split(key, 6)

    def lin(kw, kb, fan_in, fan_out):
        bound = 1.0 / jnp.sqrt(fan_in)
        w = jax.random.uniform(kw, (fan_in, fan_out), jnp.float32,
                               minval=-bound, maxval=bound)
        b = jax.random.uniform(kb, (1, fan_out), jnp.float32,
                               minval=-bound, maxval=bound)
        return w, b

    w1, b1 = lin(ks[0], ks[1], state_dim, HIDDEN)
    w2, b2 = lin(ks[2], ks[3], HIDDEN + action_dim, HIDDEN)
    w3, b3 = lin(ks[4], ks[5], HIDDEN, action_dim)
    return dict(w1=w1, b1=b1, w2=w2, b2=b2, w3=w3, b3=b3)


def reference_forward(x, a, params):
    h1 = jnp.maximum(x @ params["w1"] + params["b1"], 0.0)
    h2 = jnp.maximum(jnp.concatenate([h1, a], axis=1) @ params["w2"]
                     + params["b2"], 0.0)
    return h2 @ params["w3"] + params["b3"]


if __name__ == "__main__":
    key = jax.random.PRNGKey(0)
    k_param, k_x, k_a = jax.random.split(key, 3)

    state_dim, action_dim = 16, 8
    params = init_params(k_param, state_dim, action_dim)

    # One-time weight packing (f32 path and bf16 path).
    prep_f32 = prepare_params(params, compute_dtype=jnp.float32)
    prep_bf16 = prepare_params(params, compute_dtype=jnp.bfloat16)

    fwd = jax.jit(critic_forward, static_argnames=("batch_tile", "out_dtype"))

    # Small shapes (single 16-row tile, 1 grid step).
    B_small = 4
    x_s = jax.random.normal(k_x, (B_small, state_dim), jnp.float32)
    a_s = jax.random.normal(k_a, (B_small, action_dim), jnp.float32)
    ref_s = reference_forward(x_s, a_s, params)

    out_f32 = jax.block_until_ready(fwd(x_s, a_s, prep_f32))
    assert out_f32.shape == (B_small, action_dim)
    assert out_f32.dtype == jnp.float32
    assert jnp.allclose(out_f32, ref_s, atol=1e-4, rtol=1e-4), "f32 mismatch"

    out_bf16 = jax.block_until_ready(fwd(x_s, a_s, prep_bf16))
    assert jnp.allclose(out_bf16.astype(jnp.float32), ref_s,
                        atol=5e-2, rtol=5e-2), "bf16 mismatch"

    # Larger batch: 2 grid steps (exercises the parallel batch axis).
    B_big = 512
    kx2, ka2 = jax.random.split(jax.random.PRNGKey(1))
    x_b = jax.random.normal(kx2, (B_big, state_dim), jnp.float32)
    a_b = jax.random.normal(ka2, (B_big, action_dim), jnp.float32)
    out_b = jax.block_until_ready(fwd(x_b, a_b, prep_bf16))
    ref_b = reference_forward(x_b, a_b, params)
    assert out_b.shape == (B_big, action_dim)
    assert jnp.allclose(out_b.astype(jnp.float32), ref_b,
                        atol=5e-2, rtol=5e-2), "batch mismatch"

    # Odd batch: adaptive tile (2 x 160-row tiles instead of padding to 512).
    B_odd = 300
    kx3, ka3 = jax.random.split(jax.random.PRNGKey(2))
    x_o = jax.random.normal(kx3, (B_odd, state_dim), jnp.float32)
    a_o = jax.random.normal(ka3, (B_odd, action_dim), jnp.float32)
    out_o = jax.block_until_ready(fwd(x_o, a_o, prep_bf16))
    ref_o = reference_forward(x_o, a_o, params)
    assert out_o.shape == (B_odd, action_dim)
    assert jnp.allclose(out_o.astype(jnp.float32), ref_o,
                        atol=5e-2, rtol=5e-2), "odd-batch mismatch"

    print("KERNEL_OK")
</pallas_src>

<mosaic_0001>
module attributes {stable_mosaic.version = 11 : i64} {
  func.func @critic_kernel(%arg0: i32, %arg1: memref<16x16xf32, #tpu.memory_space<vmem>>, %arg2: memref<16x8xf32, #tpu.memory_space<vmem>>, %arg3: memref<16x256xf32, #tpu.memory_space<vmem>>, %arg4: memref<1x256xf32, #tpu.memory_space<vmem>>, %arg5: memref<256x256xf32, #tpu.memory_space<vmem>>, %arg6: memref<8x256xf32, #tpu.memory_space<vmem>>, %arg7: memref<1x256xf32, #tpu.memory_space<vmem>>, %arg8: memref<256x128xf32, #tpu.memory_space<vmem>>, %arg9: memref<1x128xf32, #tpu.memory_space<vmem>>, %arg10: memref<16x128xf32, #tpu.memory_space<vmem>>) attributes {dimension_semantics = [#tpu.dimension_semantics<parallel>], iteration_bounds = array<i64: 1>, scalar_prefetch = 0 : i64, scratch_operands = 0 : i64, tpu.core_type = #tpu.core_type<tc>, window_params = [{transform_indices = @transform_0, window_bounds = array<i64: 16, 16>}, {transform_indices = @transform_1, window_bounds = array<i64: 16, 8>}, {pipeline_mode = #tpu.pipeline_mode<synchronous>, transform_indices = @transform_2, window_bounds = array<i64: 16, 256>}, {pipeline_mode = #tpu.pipeline_mode<synchronous>, transform_indices = @transform_3, window_bounds = array<i64: 1, 256>}, {pipeline_mode = #tpu.pipeline_mode<synchronous>, transform_indices = @transform_4, window_bounds = array<i64: 256, 256>}, {pipeline_mode = #tpu.pipeline_mode<synchronous>, transform_indices = @transform_5, window_bounds = array<i64: 8, 256>}, {pipeline_mode = #tpu.pipeline_mode<synchronous>, transform_indices = @transform_6, window_bounds = array<i64: 1, 256>}, {pipeline_mode = #tpu.pipeline_mode<synchronous>, transform_indices = @transform_7, window_bounds = array<i64: 256, 128>}, {pipeline_mode = #tpu.pipeline_mode<synchronous>, transform_indices = @transform_8, window_bounds = array<i64: 1, 128>}, {transform_indices = @transform_9, window_bounds = array<i64: 16, 128>}]} {
    %c0 = arith.constant 0 : index
    %c0_0 = arith.constant 0 : index
    %0 = vector.load %arg1[%c0, %c0_0] : memref<16x16xf32, #tpu.memory_space<vmem>>, vector<16x16xf32>
    %c0_1 = arith.constant 0 : index
    %c0_2 = arith.constant 0 : index
    %1 = vector.load %arg2[%c0_1, %c0_2] : memref<16x8xf32, #tpu.memory_space<vmem>>, vector<16x8xf32>
    %c0_3 = arith.constant 0 : index
    %c0_4 = arith.constant 0 : index
    %2 = vector.load %arg3[%c0_3, %c0_4] : memref<16x256xf32, #tpu.memory_space<vmem>>, vector<16x256xf32>
    %cst = arith.constant dense<0.000000e+00> : vector<16x256xf32>
    %3 = tpu.matmul %0, %2, %cst {dimension_numbers = #tpu.dot_dimension_numbers<[1], [0], [0], [1], [0, 0, 1, 1], [], []>} : vector<16x16xf32>, vector<16x256xf32>, vector<16x256xf32> -> vector<16x256xf32>
    %c0_5 = arith.constant 0 : index
    %c0_6 = arith.constant 0 : index
    %4 = vector.load %arg4[%c0_5, %c0_6] : memref<1x256xf32, #tpu.memory_space<vmem>>, vector<1x256xf32>
    %5 = vector.broadcast %4 : vector<1x256xf32> to vector<16x256xf32>
    %6 = arith.addf %3, %5 : vector<16x256xf32>
    %cst_7 = arith.constant 0.000000e+00 : f32
    %7 = vector.broadcast %cst_7 : f32 to vector<16x256xf32>
    %8 = arith.maximumf %6, %7 : vector<16x256xf32>
    %c0_8 = arith.constant 0 : index
    %c0_9 = arith.constant 0 : index
    %9 = vector.load %arg5[%c0_8, %c0_9] : memref<256x256xf32, #tpu.memory_space<vmem>>, vector<256x256xf32>
    %cst_10 = arith.constant dense<0.000000e+00> : vector<16x256xf32>
    %10 = tpu.matmul %8, %9, %cst_10 {dimension_numbers = #tpu.dot_dimension_numbers<[1], [0], [0], [1], [0, 0, 1, 1], [], []>} : vector<16x256xf32>, vector<256x256xf32>, vector<16x256xf32> -> vector<16x256xf32>
    %c0_11 = arith.constant 0 : index
    %c0_12 = arith.constant 0 : index
    %11 = vector.load %arg6[%c0_11, %c0_12] : memref<8x256xf32, #tpu.memory_space<vmem>>, vector<8x256xf32>
    %cst_13 = arith.constant dense<0.000000e+00> : vector<16x256xf32>
    %12 = tpu.matmul %1, %11, %cst_13 {dimension_numbers = #tpu.dot_dimension_numbers<[1], [0], [0], [1], [0, 0, 1, 1], [], []>} : vector<16x8xf32>, vector<8x256xf32>, vector<16x256xf32> -> vector<16x256xf32>
    %13 = arith.addf %10, %12 : vector<16x256xf32>
    %c0_14 = arith.constant 0 : index
    %c0_15 = arith.constant 0 : index
    %14 = vector.load %arg7[%c0_14, %c0_15] : memref<1x256xf32, #tpu.memory_space<vmem>>, vector<1x256xf32>
    %15 = vector.broadcast %14 : vector<1x256xf32> to vector<16x256xf32>
    %16 = arith.addf %13, %15 : vector<16x256xf32>
    %cst_16 = arith.constant 0.000000e+00 : f32
    %17 = vector.broadcast %cst_16 : f32 to vector<16x256xf32>
    %18 = arith.maximumf %16, %17 : vector<16x256xf32>
    %c0_17 = arith.constant 0 : index
    %c0_18 = arith.constant 0 : index
    %19 = vector.load %arg8[%c0_17, %c0_18] : memref<256x128xf32, #tpu.memory_space<vmem>>, vector<256x128xf32>
    %cst_19 = arith.constant dense<0.000000e+00> : vector<16x128xf32>
    %20 = tpu.matmul %18, %19, %cst_19 {dimension_numbers = #tpu.dot_dimension_numbers<[1], [0], [0], [1], [0, 0, 1, 1], [], []>} : vector<16x256xf32>, vector<256x128xf32>, vector<16x128xf32> -> vector<16x128xf32>
    %c0_20 = arith.constant 0 : index
    %c0_21 = arith.constant 0 : index
    %21 = vector.load %arg9[%c0_20, %c0_21] : memref<1x128xf32, #tpu.memory_space<vmem>>, vector<1x128xf32>
    %22 = vector.broadcast %21 : vector<1x128xf32> to vector<16x128xf32>
    %23 = arith.addf %20, %22 : vector<16x128xf32>
    %c0_22 = arith.constant 0 : index
    %c0_23 = arith.constant 0 : index
    %24 = vector.load %arg10[%c0_22, %c0_23] : memref<16x128xf32, #tpu.memory_space<vmem>>, vector<16x128xf32>
    tpu.vector_store %arg10[%c0_22, %c0_23], %23 {strides = array<i32>} : memref<16x128xf32, #tpu.memory_space<vmem>>, vector<16x128xf32>,
    return
  }
  func.func @transform_0(%arg0: i32) -> (i32, i32) {
    %c0_i32 = arith.constant 0 : i32
    %c0_i32_0 = arith.constant 0 : i32
    return %arg0, %c0_i32 : i32, i32
  }
  func.func @transform_1(%arg0: i32) -> (i32, i32) {
    %c0_i32 = arith.constant 0 : i32
    %c0_i32_0 = arith.constant 0 : i32
    return %arg0, %c0_i32 : i32, i32
  }
  func.func @transform_2(%arg0: i32) -> (i32, i32) {
    %c0_i32 = arith.constant 0 : i32
    %c0_i32_0 = arith.constant 0 : i32
    %c0_i32_1 = arith.constant 0 : i32
    return %c0_i32, %c0_i32_0 : i32, i32
  }
  func.func @transform_3(%arg0: i32) -> (i32, i32) {
    %c0_i32 = arith.constant 0 : i32
    %c0_i32_0 = arith.constant 0 : i32
    %c0_i32_1 = arith.constant 0 : i32
    return %c0_i32, %c0_i32_0 : i32, i32
  }
  func.func @transform_4(%arg0: i32) -> (i32, i32) {
    %c0_i32 = arith.constant 0 : i32
    %c0_i32_0 = arith.constant 0 : i32
    %c0_i32_1 = arith.constant 0 : i32
    return %c0_i32, %c0_i32_0 : i32, i32
  }
  func.func @transform_5(%arg0: i32) -> (i32, i32) {
    %c0_i32 = arith.constant 0 : i32
    %c0_i32_0 = arith.constant 0 : i32
    %c0_i32_1 = arith.constant 0 : i32
    return %c0_i32, %c0_i32_0 : i32, i32
  }
  func.func @transform_6(%arg0: i32) -> (i32, i32) {
    %c0_i32 = arith.constant 0 : i32
    %c0_i32_0 = arith.constant 0 : i32
    %c0_i32_1 = arith.constant 0 : i32
    return %c0_i32, %c0_i32_0 : i32, i32
  }
  func.func @transform_7(%arg0: i32) -> (i32, i32) {
    %c0_i32 = arith.constant 0 : i32
    %c0_i32_0 = arith.constant 0 : i32
    %c0_i32_1 = arith.constant 0 : i32
    return %c0_i32, %c0_i32_0 : i32, i32
  }
  func.func @transform_8(%arg0: i32) -> (i32, i32) {
    %c0_i32 = arith.constant 0 : i32
    %c0_i32_0 = arith.constant 0 : i32
    %c0_i32_1 = arith.constant 0 : i32
    return %c0_i32, %c0_i32_0 : i32, i32
  }
  func.func @transform_9(%arg0: i32) -> (i32, i32) {
    %c0_i32 = arith.constant 0 : i32
    %c0_i32_0 = arith.constant 0 : i32
    return %arg0, %c0_i32 : i32, i32
  }
}

</mosaic_0001>

<bundles_post_ra>
// kernel: critic_forward.1
= control target key start
LH: loop header
LB: loop body
LE: loop exit
PB: predicated region body
PF: predicated region fallthrough
CT: control target
= control target key end

     0   :  { %14 = vsyncpa [#allocation3], 0  ;;  %s778_s0 = inlined_call_operand.vmem [shape: f32[16,16], index: 0, kind: input, shape index: {}]   ;;  %s779_s1 = inlined_call_operand.vmem [shape: f32[16,8], index: 1, kind: input, shape index: {}]   ;;  %s780_s2 = inlined_call_operand.vmem [shape: f32[16,256], index: 2, kind: input, shape index: {}]   ;;  %s781_s3 = inlined_call_operand.vmem [shape: f32[1,256], index: 3, kind: input, shape index: {}]   ;;  %s782_s4 = inlined_call_operand.hbm [shape: f32[256,256], index: 4, kind: input, shape index: {}]   ;;  %s783_s5 = inlined_call_operand.vmem [shape: f32[8,256], index: 5, kind: input, shape index: {}]   ;;  %s784_s6 = inlined_call_operand.hbm [shape: f32[1,256], index: 6, kind: input, shape index: {}]   ;;  %s785_s7 = inlined_call_operand.hbm [shape: f32[256,128], index: 7, kind: input, shape index: {}]   ;;  %s786_s8 = inlined_call_operand.vmem [shape: f32[1,128], index: 8, kind: input, shape index: {}]   ;;  %s787_s9 = inlined_call_operand.vmem [shape: f32[16,128], index: 9, kind: output, shape index: {}]  }
   0x1   :  { %15 = vsyncpa [#allocation5], 0  ;;  %s663_s30 = smov [#allocation4]   ;;  %s664_s11 = smov [#allocation2]  }
   0x2   :  { %s44_s10 = sshll.u32 %s663_s30, 4  ;;  %s29_s12 = sshll.u32 %s664_s11, 4  ;;  %s45_s10 = int_to_ptr.vmem [resolvable:$true] %s44_s10  ;;  %s30_s12 = int_to_ptr.vmem [resolvable:$true] %s29_s12 }
   0x3   :  { %s607_s13 = scalar_lea.vmem %s45_s10, 32  ;;  %p612_p1 = scmp.lt.s32.totalorder %s45_s10, %s45_s10 }
   0x4   :  { %p608_p0 = scmp.ne.s32.totalorder %s45_s10, %s607_s13  ;;  %p613_p2 = scmp.lt.s32.totalorder %s607_s13, %s607_s13 }
   0x6   :  { %p614_p3 = por %p613_p2, %p612_p1 }
   0x8   :  { %p615_p4 = pnand %p614_p3, %p608_p0 }
   0xa   :  { %618 = shalt.err (!%p615_p4)
}
   0xb   :  { %47 = dma.hbm_to_vmem [thread:$0]  %s784_s6, 32, %s45_s10, [#allocation5]  }
   0xc   :  { %s627_s16 = scalar_lea.vmem %s30_s12, 8192  ;;  %p632_p6 = scmp.lt.s32.totalorder %s30_s12, %s30_s12 }
   0xd   :  { %p628_p5 = scmp.ne.s32.totalorder %s30_s12, %s627_s16  ;;  %p633_p7 = scmp.lt.s32.totalorder %s627_s16, %s627_s16 }
   0xf   :  { %p634_p8 = por %p633_p7, %p632_p6 }
  0x11   :  { %p635_p9 = pnand %p634_p8, %p628_p5 }
  0x13   :  { %638 = shalt.err (!%p635_p9)
}
  0x14   :  { %s665_s17 = smov 256   ;;  %s666_s18 = smov 16  }
  0x15   :  { %35 = dma.hbm_to_vmem [thread:$0]  %s782_s4, 8192, %s30_s12, [#allocation3], %s665_s17, %s665_s17, %s666_s18  }
  0x16   :  { %s667_s21 = smov [#allocation6]  }
  0x17   :  { %s53_s22 = sshll.u32 %s667_s21, 4  ;;  %s54_s22 = int_to_ptr.vmem [resolvable:$true] %s53_s22 }
  0x18   :  { %s647_s23 = scalar_lea.vmem %s54_s22, 4096  ;;  %p652_p11 = scmp.lt.s32.totalorder %s54_s22, %s54_s22 }
  0x19   :  { %p648_p10 = scmp.ne.s32.totalorder %s54_s22, %s647_s23  ;;  %p653_p12 = scmp.lt.s32.totalorder %s647_s23, %s647_s23 }
  0x1b   :  { %p654_p13 = por %p653_p12, %p652_p11 }
  0x1d   :  { %p655_p0 = pnand %p654_p13, %p648_p10 }
  0x1f   :  { %658 = shalt.err (!%p655_p0)
}
  0x20   :  { %s668_s6 = smov 128   ;;  %s669_s24 = smov 8  }
  0x21   :  { %59 = dma.hbm_to_vmem [thread:$0]  %s785_s7, 4096, %s54_s22, [#allocation5], %s668_s6, %s668_s6, %s669_s24  }
  0x22   :  { %659 = dma.done.wait [#allocation3], 8192  }
  0x23   :  { %660 = vsyncadd [#allocation3], 4294959104 }
  0x24   :  { %661 = dma.done.wait [#allocation5], 4128  }
  0x25   :  { %662 = vsyncadd [#allocation5], 4294963168  ;;  %v670_v0 = vmov 0.0   ;;  %v78_v1 = vld [vmem:[%s780_s2 + $0x18] sm:$0xff]  ;;  %v77_v2 = vld [vmem:[%s780_s2 + $0x10] sm:$0xff]  ;;  %vm91_vm0 = vcmask 130048  }
  0x26   :  { %162 = vmatprep.mubr.f32.mxu0 %v670_v0  ;;  %v76_v3 = vld [vmem:[%s780_s2 + $0x8] sm:$0xff]  ;;  %126 = vmatprep.subr.mxu0 %v78_v1  ;;  %v75_v4 = vld [vmem:[%s780_s2] sm:$0xff]  ;;  %v210_v6 = vld [vmem:[#allocation2 + $0xf8] sm:$0xff]  ;;  %vm245_vm1 = vcmask 64512  }
  0x27   :  { %v71_v5 = vld [vmem:[%s778_s0] sm:$0xff]  ;;  %127 = vmatpush1.msra.mxu0 %v77_v2  ;;  %v209_v7 = vld [vmem:[#allocation2 + $0xf0] sm:$0xff]  ;;  %v208_v8 = vld [vmem:[#allocation2 + $0xe8] sm:$0xff]  ;;  %329 = vmatprep.subr.mxu1 %v210_v6 }
  0x28   :  { %128 = vmatprep.subr.mxu0 %v76_v3  ;;  %v207_v9 = vld [vmem:[#allocation2 + $0xe0] sm:$0xff]  ;;  %330 = vmatpush1.msra.mxu1 %v209_v7  ;;  %v206_v10 = vld [vmem:[#allocation2 + $0xd8] sm:$0xff]  ;;  %v205_v11 = vld [vmem:[#allocation2 + $0xd0] sm:$0xff] }
  0x29   :  { %129 = vmatpush1.msra.mxu0 %v75_v4  ;;  %331 = vmatprep.subr.mxu1 %v208_v8  ;;  %v72_v12 = vld [vmem:[%s778_s0 + $0x8] sm:$0xff]  ;;  %v203_v14 = vld [vmem:[#allocation2 + $0xc0] sm:$0xff]  ;;  %v202_v15 = vld [vmem:[#allocation2 + $0xb8] sm:$0xff] }
  0x2a   :  { %548 = vmatmul.mubr.msk.f32.vlgmr.msra.gmra.mxu0 %vm91_vm0, %v71_v5  ;;  %332 = vmatpush1.msra.mxu1 %v207_v9  ;;  %v204_v13 = vld [vmem:[#allocation2 + $0xc8] sm:$0xff]  ;;  %v201_v16 = vld [vmem:[#allocation2 + $0xb0] sm:$0xff]  ;;  %v199_v18 = vld [vmem:[#allocation2 + $0xa0] sm:$0xff] }
  0x2b   :  { %168 = vmatprep.mubr.f32.mxu0 %v670_v0  ;;  %333 = vmatprep.subr.mxu1 %v206_v10  ;;  %v200_v17 = vld [vmem:[#allocation2 + $0xa8] sm:$0xff]  ;;  %v198_v19 = vld [vmem:[#allocation2 + $0x98] sm:$0xff]  ;;  %v197_v20 = vld [vmem:[#allocation2 + $0x90] sm:$0xff] }
  0x2c   :  { %334 = vmatpush1.msra.mxu1 %v205_v11  ;;  %v196_v21 = vld [vmem:[#allocation2 + $0x88] sm:$0xff]  ;;  %v195_v22 = vld [vmem:[#allocation2 + $0x80] sm:$0xff]  ;;  %v194_v23 = vld [vmem:[#allocation2 + $0x78] sm:$0xff] }
  0x2d   :  { %335 = vmatprep.subr.mxu1 %v204_v13  ;;  %v193_v24 = vld [vmem:[#allocation2 + $0x70] sm:$0xff]  ;;  %v192_v25 = vld [vmem:[#allocation2 + $0x68] sm:$0xff]  ;;  %v191_v26 = vld [vmem:[#allocation2 + $0x60] sm:$0xff] }
  0x2e   :  { %549 = vmatmul.mubr.msk.f32.gmra.mxu0 %vm91_vm0, %v72_v12  ;;  %336 = vmatpush1.msra.mxu1 %v203_v14  ;;  %v190_v27 = vld [vmem:[#allocation2 + $0x58] sm:$0xff]  ;;  %v244_v28 = vld [vmem:[%s783_s5 + $0x8] sm:$0xff]  ;;  %v189_v29 = vld [vmem:[#allocation2 + $0x50] sm:$0xff] }
  0x2f   :  { %316 = vmatprep.mubr.f32.mxu0 %v670_v0  ;;  %337 = vmatprep.subr.mxu1 %v202_v15  ;;  %v188_v30 = vld [vmem:[#allocation2 + $0x48] sm:$0xff]  ;;  %v187_v31 = vld [vmem:[#allocation2 + $0x40] sm:$0xff]  ;;  %v186_v32 = vld [vmem:[#allocation2 + $0x38] sm:$0xff] }
  0x30   :  { %338 = vmatpush1.msra.mxu1 %v201_v16  ;;  %282 = vmatprep.subr.mxu0 %v244_v28  ;;  %v185_v33 = vld [vmem:[#allocation2 + $0x30] sm:$0xff]  ;;  %v184_v34 = vld [vmem:[#allocation2 + $0x28] sm:$0xff]  ;;  %v183_v35 = vld [vmem:[#allocation2 + $0x20] sm:$0xff] }
  0x31   :  { %339 = vmatprep.subr.mxu1 %v200_v17  ;;  %v182_v36 = vld [vmem:[#allocation2 + $0x18] sm:$0xff]  ;;  %v181_v37 = vld [vmem:[#allocation2 + $0x10] sm:$0xff]  ;;  %v180_v38 = vld [vmem:[#allocation2 + $0x8] sm:$0xff] }
  0x32   :  { %340 = vmatpush1.msra.mxu1 %v199_v18  ;;  %v179_v39 = vld [vmem:[#allocation2] sm:$0xff]  ;;  %v242_v40 = vld [vmem:[#allocation2 + $0x1f8] sm:$0xff]  ;;  %v241_v41 = vld [vmem:[#allocation2 + $0x1f0] sm:$0xff] }
  0x33   :  { %341 = vmatprep.subr.mxu1 %v198_v19  ;;  %v240_v42 = vld [vmem:[#allocation2 + $0x1e8] sm:$0xff]  ;;  %v239_v43 = vld [vmem:[#allocation2 + $0x1e0] sm:$0xff]  ;;  %v238_v44 = vld [vmem:[#allocation2 + $0x1d8] sm:$0xff] }
  0x34   :  { %342 = vmatpush1.msra.mxu1 %v197_v20  ;;  %v237_v45 = vld [vmem:[#allocation2 + $0x1d0] sm:$0xff]  ;;  %v236_v46 = vld [vmem:[#allocation2 + $0x1c8] sm:$0xff]  ;;  %v235_v47 = vld [vmem:[#allocation2 + $0x1c0] sm:$0xff] }
  0x35   :  { %343 = vmatprep.subr.mxu1 %v196_v21  ;;  %v234_v48 = vld [vmem:[#allocation2 + $0x1b8] sm:$0xff]  ;;  %v233_v49 = vld [vmem:[#allocation2 + $0x1b0] sm:$0xff]  ;;  %v232_v50 = vld [vmem:[#allocation2 + $0x1a8] sm:$0xff] }
  0x36   :  { %344 = vmatpush1.msra.mxu1 %v195_v22  ;;  %v231_v51 = vld [vmem:[#allocation2 + $0x1a0] sm:$0xff]  ;;  %v230_v52 = vld [vmem:[#allocation2 + $0x198] sm:$0xff]  ;;  %v229_v53 = vld [vmem:[#allocation2 + $0x190] sm:$0xff] }
  0x37   :  { %345 = vmatprep.subr.mxu1 %v194_v23  ;;  %v228_v54 = vld [vmem:[#allocation2 + $0x188] sm:$0xff]  ;;  %v227_v55 = vld [vmem:[#allocation2 + $0x180] sm:$0xff]  ;;  %v226_v56 = vld [vmem:[#allocation2 + $0x178] sm:$0xff] }
  0x38   :  { %346 = vmatpush1.msra.mxu1 %v193_v24  ;;  %v225_v57 = vld [vmem:[#allocation2 + $0x170] sm:$0xff]  ;;  %v224_v58 = vld [vmem:[#allocation2 + $0x168] sm:$0xff]  ;;  %v223_v59 = vld [vmem:[#allocation2 + $0x160] sm:$0xff] }
  0x39   :  { %347 = vmatprep.subr.mxu1 %v192_v25  ;;  %v222_v60 = vld [vmem:[#allocation2 + $0x158] sm:$0xff]  ;;  %v221_v61 = vld [vmem:[#allocation2 + $0x150] sm:$0xff]  ;;  %v220_v62 = vld [vmem:[#allocation2 + $0x148] sm:$0xff] }
  0x3a   :  { %348 = vmatpush1.msra.mxu1 %v191_v26  ;;  %v219_v63 = vld [vmem:[#allocation2 + $0x140] sm:$0xff]  ;;  %v218_v1 = vld [vmem:[#allocation2 + $0x138] sm:$0xff]  ;;  %v217_v2 = vld [vmem:[#allocation2 + $0x130] sm:$0xff] }
  0x3b   :  { %349 = vmatprep.subr.mxu1 %v190_v27  ;;  %v216_v3 = vld [vmem:[#allocation2 + $0x128] sm:$0xff]  ;;  %v215_v4 = vld [vmem:[#allocation2 + $0x120] sm:$0xff]  ;;  %v214_v6 = vld [vmem:[#allocation2 + $0x118] sm:$0xff] }
  0x3c   :  { %350 = vmatpush1.msra.mxu1 %v189_v29  ;;  %v243_v5 = vld [vmem:[%s783_s5] sm:$0xff]  ;;  %v213_v7 = vld [vmem:[#allocation2 + $0x110] sm:$0xff]  ;;  %v212_v9 = vld [vmem:[#allocation2 + $0x108] sm:$0xff] }
  0x3d   :  { %351 = vmatprep.subr.mxu1 %v188_v30  ;;  %283 = vmatpush1.msra.mxu0 %v243_v5  ;;  %v73_v8 = vld [vmem:[%s779_s1] sm:$0xff]  ;;  %v74_v11 = vld [vmem:[%s779_s1 + $0x8] sm:$0xff]  ;;  %v456_v14 = vld [vmem:[#allocation6 + $0xf0] sm:$0xff] }
  0x3e   :  { %352 = vmatpush1.msra.mxu1 %v187_v31  ;;  %550 = vmatmul.mubr.msk.f32.vlgmr.msra.gmra.mxu0 %vm245_vm1, %v73_v8  ;;  %v211_v10 = vld [vmem:[#allocation2 + $0x100] sm:$0xff]  ;;  %v440_v15 = vld [vmem:[#allocation6 + $0x70] sm:$0xff]  ;;  %v455_v16 = vld [vmem:[#allocation6 + $0xe8] sm:$0xff] }
  0x3f   :  { %353 = vmatprep.subr.mxu1 %v186_v32  ;;  %322 = vmatprep.mubr.f32.mxu0 %v670_v0  ;;  %v457_v12 = vld [vmem:[#allocation6 + $0xf8] sm:$0xff]  ;;  %v439_v17 = vld [vmem:[#allocation6 + $0x68] sm:$0xff]  ;;  %v454_v18 = vld [vmem:[#allocation6 + $0xe0] sm:$0xff] }
  0x40   :  { %354 = vmatpush1.msra.mxu1 %v185_v33  ;;  %v441_v13 = vld [vmem:[#allocation6 + $0x78] sm:$0xff]  ;;  %553 = vmatprep.subr.mxu0 %v457_v12  ;;  %v438_v19 = vld [vmem:[#allocation6 + $0x60] sm:$0xff]  ;;  %v452_v21 = vld [vmem:[#allocation6 + $0xd0] sm:$0xff]  ;;  %v81_v33 = vlaneseq }
  0x41   :  { %355 = vmatprep.subr.mxu1 %v184_v34  ;;  %554 = vmatpush3.msra.mxu0 %v441_v13  ;;  %v453_v0 = vld [vmem:[#allocation6 + $0xd8] sm:$0xff]  ;;  %v436_v22 = vld [vmem:[#allocation6 + $0x50] sm:$0xff]  ;;  %v451_v23 = vld [vmem:[#allocation6 + $0xc8] sm:$0xff] }
  0x42   :  { %356 = vmatpush1.msra.mxu1 %v183_v35  ;;  %551 = vmatmul.mubr.msk.f32.gmra.mxu0 %vm245_vm1, %v74_v11  ;;  %v437_v20 = vld [vmem:[#allocation6 + $0x58] sm:$0xff]  ;;  %v435_v24 = vld [vmem:[#allocation6 + $0x48] sm:$0xff]  ;;  %v450_v25 = vld [vmem:[#allocation6 + $0xc0] sm:$0xff]  ;;  %v82_v34 = vshrl.u32 %v81_v33, 7 }
  0x43   :  { %357 = vmatprep.subr.mxu1 %v182_v36  ;;  %555 = vmatprep.subr.mxu0 %v456_v14  ;;  %v434_v26 = vld [vmem:[#allocation6 + $0x40] sm:$0xff]  ;;  %v449_v27 = vld [vmem:[#allocation6 + $0xb8] sm:$0xff]  ;;  %v448_v29 = vld [vmem:[#allocation6 + $0xb0] sm:$0xff] }
  0x44   :  { %358 = vmatpush1.msra.mxu1 %v181_v37  ;;  %556 = vmatpush3.msra.mxu0 %v440_v15  ;;  %v433_v28 = vld [vmem:[#allocation6 + $0x38] sm:$0xff]  ;;  %v432_v30 = vld [vmem:[#allocation6 + $0x30] sm:$0xff]  ;;  %v447_v31 = vld [vmem:[#allocation6 + $0xa8] sm:$0xff]  ;;  %v83_v35 = vsub.s32 0, %v82_v34  ;;  %v87_v37 = vsub.s32 1, %v82_v34 }
  0x45   :  { %359 = vmatprep.subr.mxu1 %v180_v38  ;;  %557 = vmatprep.subr.mxu0 %v455_v16  ;;  %v431_v32 = vld [vmem:[#allocation6 + $0x28] sm:$0xff]  ;;  %v79_v36 = vld [vmem:[%s781_s3] sm:$0x3] }
  0x46   :  { %360 = vmatpush1.msra.mxu1 %v179_v39  ;;  %558 = vmatpush3.msra.mxu0 %v439_v17  ;;  %v84_v38 = vrot.slane %v79_v36, %v83_v35  ;;  %v88_v39 = vrot.slane %v79_v36, %v87_v37 }
  0x47   :  { %361 = vmatprep.subr.mxu1 %v242_v40  ;;  %559 = vmatprep.subr.mxu0 %v454_v18 }
  0x48   :  { %362 = vmatpush2.msra.mxu1 %v241_v41  ;;  %560 = vmatpush3.msra.mxu0 %v438_v19 }
  0x49   :  { %363 = vmatprep.subr.mxu1 %v240_v42  ;;  %561 = vmatprep.subr.mxu0 %v453_v0 }
  0x4a   :  { %364 = vmatpush2.msra.mxu1 %v239_v43  ;;  %562 = vmatpush3.msra.mxu0 %v437_v20 }
  0x4b   :  { %365 = vmatprep.subr.mxu1 %v238_v44  ;;  %563 = vmatprep.subr.mxu0 %v452_v21 }
  0x4c   :  { %366 = vmatpush2.msra.mxu1 %v237_v45  ;;  %564 = vmatpush3.msra.mxu0 %v436_v22  ;;  %v552_v22 = vld [vmem:[%s786_s8] ss:$0 sm:$0xff] }
  0x4d   :  { %367 = vmatprep.subr.mxu1 %v236_v46  ;;  %565 = vmatprep.subr.mxu0 %v451_v23 }
  0x4e   :  { %368 = vmatpush2.msra.mxu1 %v235_v47  ;;  %566 = vmatpush3.msra.mxu0 %v435_v24 }
  0x4f   :  { %369 = vmatprep.subr.mxu1 %v234_v48  ;;  %567 = vmatprep.subr.mxu0 %v450_v25 }
  0x50   :  { %370 = vmatpush2.msra.mxu1 %v233_v49  ;;  %568 = vmatpush3.msra.mxu0 %v434_v26 }
  0x51   :  { %371 = vmatprep.subr.mxu1 %v232_v50  ;;  %569 = vmatprep.subr.mxu0 %v449_v27 }
  0x52   :  { %372 = vmatpush2.msra.mxu1 %v231_v51  ;;  %570 = vmatpush3.msra.mxu0 %v433_v28 }
  0x53   :  { %373 = vmatprep.subr.mxu1 %v230_v52  ;;  %571 = vmatprep.subr.mxu0 %v448_v29  ;;  %v446_v52 = vld [vmem:[#allocation6 + $0xa0] sm:$0xff] }
  0x54   :  { %374 = vmatpush2.msra.mxu1 %v229_v53  ;;  %572 = vmatpush3.msra.mxu0 %v432_v30  ;;  %v430_v53 = vld [vmem:[#allocation6 + $0x20] sm:$0xff] }
  0x55   :  { %375 = vmatprep.subr.mxu1 %v228_v54  ;;  %573 = vmatprep.subr.mxu0 %v447_v31  ;;  %v445_v54 = vld [vmem:[#allocation6 + $0x98] sm:$0xff] }
  0x56   :  { %376 = vmatpush2.msra.mxu1 %v227_v55  ;;  %574 = vmatpush3.msra.mxu0 %v431_v32  ;;  %v429_v55 = vld [vmem:[#allocation6 + $0x18] sm:$0xff] }
  0x57   :  { %377 = vmatprep.subr.mxu1 %v226_v56  ;;  %575 = vmatprep.subr.mxu0 %v446_v52  ;;  %v444_v56 = vld [vmem:[#allocation6 + $0x90] sm:$0xff] }
  0x58   :  { %378 = vmatpush2.msra.mxu1 %v225_v57  ;;  %576 = vmatpush3.msra.mxu0 %v430_v53  ;;  %v428_v57 = vld [vmem:[#allocation6 + $0x10] sm:$0xff] }
  0x59   :  { %379 = vmatprep.subr.mxu1 %v224_v58  ;;  %577 = vmatprep.subr.mxu0 %v445_v54  ;;  %v443_v58 = vld [vmem:[#allocation6 + $0x88] sm:$0xff] }
  0x5a   :  { %380 = vmatpush2.msra.mxu1 %v223_v59  ;;  %578 = vmatpush3.msra.mxu0 %v429_v55  ;;  %v427_v59 = vld [vmem:[#allocation6 + $0x8] sm:$0xff] }
  0x5b   :  { %381 = vmatprep.subr.mxu1 %v222_v60  ;;  %579 = vmatprep.subr.mxu0 %v444_v56  ;;  %v442_v60 = vld [vmem:[#allocation6 + $0x80] sm:$0xff] }
  0x5c   :  { %382 = vmatpush2.msra.mxu1 %v221_v61  ;;  %580 = vmatpush3.msra.mxu0 %v428_v57  ;;  %v426_v61 = vld [vmem:[#allocation6] sm:$0xff] }
  0x5d   :  { %383 = vmatprep.subr.mxu1 %v220_v62  ;;  %581 = vmatprep.subr.mxu0 %v443_v58 }
  0x5e   :  { %384 = vmatpush2.msra.mxu1 %v219_v63  ;;  %582 = vmatpush3.msra.mxu0 %v427_v59  ;;  %v406_v63 = vld [vmem:[#allocation4] sm:$0x3] }
  0x5f   :  { %385 = vmatprep.subr.mxu1 %v218_v1  ;;  %583 = vmatprep.subr.mxu0 %v442_v60  ;;  %v415_v5 = vrot.slane %v406_v63, %v87_v37 }
  0x60   :  { %386 = vmatpush2.msra.mxu1 %v217_v2  ;;  %584 = vmatpush3.msra.mxu0 %v426_v61 }
  0x61   :  { %387 = vmatprep.subr.mxu1 %v216_v3  ;;  %v411_v3 = vrot.slane %v406_v63, %v83_v35 }
  0x62   :  { %388 = vmatpush2.msra.mxu1 %v215_v4 }
  0x63   :  { %389 = vmatprep.subr.mxu1 %v214_v6 }
  0x64   :  { %390 = vmatpush2.msra.mxu1 %v213_v7 }
  0x65   :  { %391 = vmatprep.subr.mxu1 %v212_v9 }
  0x66   :  { %392 = vmatpush2.msra.mxu1 %v211_v10 }
  0xea   :  { %v164_v40 = vpop.f32.mrf.mxu0 }
  0xeb   :  { %v165_v41 = vadd.f32 %v164_v40, %v84_v38 }
  0xec   :  { %v166_v42 = vpop.f32.mrf.mxu0 }
  0xed   :  { %v167_v43 = vadd.f32 %v166_v42, %v88_v39  ;;  %v175_v46 = vmax.f32 %v165_v41, 0.0 }
  0xee   :  { %v170_v44 = vpop.f32.mrf.mxu0 }
  0xef   :  { %v176_v45 = vmax.f32 %v167_v43, 0.0  ;;  %v171_v47 = vadd.f32 %v170_v44, %v84_v38 }
  0xf0   :  { %v172_v48 = vpop.f32.mrf.mxu0 }
  0xf1   :  { %v173_v49 = vadd.f32 %v172_v48, %v88_v39  ;;  %393 = vmatprep.mubr.f32.mxu1 %v176_v45  ;;  %v177_v51 = vmax.f32 %v171_v47, 0.0 }
  0xf2   :  { %394 = vmatmul.mubr.f32.vlgmr.msra.gmra.mxu1 %v175_v46 }
  0xf3   :  { %v178_v50 = vmax.f32 %v173_v49, 0.0 }
  0xf5   :  { %399 = vmatprep.mubr.f32.mxu1 %v178_v50 }
  0xf6   :  { %400 = vmatmul.mubr.f32.gmra.mxu1 %v177_v51 }
  0xfe   :  { %v318_v62 = vpop.f32.mrf.mxu0 }
 0x100   :  { %v320_v1 = vpop.f32.mrf.mxu0 }
 0x102   :  { %v324_v6 = vpop.f32.mrf.mxu0 }
 0x104   :  { %v326_v13 = vpop.f32.mrf.mxu0 }
 0x1b2   :  { %v395_v2 = vpop.f32.mrf.mxu1 }
 0x1b3   :  { %v396_v4 = vadd.f32 %v395_v2, %v318_v62 }
 0x1b4   :  { %v397_v7 = vpop.f32.mrf.mxu1 }
 0x1b5   :  { %v398_v8 = vadd.f32 %v397_v7, %v320_v1  ;;  %v418_v9 = vadd.f32 %v411_v3, %v396_v4 }
 0x1b6   :  { %v401_v10 = vpop.f32.mrf.mxu1 }
 0x1b7   :  { %v419_v11 = vadd.f32 %v415_v5, %v398_v8  ;;  %v402_v12 = vadd.f32 %v401_v10, %v324_v6  ;;  %v422_v17 = vmax.f32 %v418_v9, 0.0 }
 0x1b8   :  { %v403_v14 = vpop.f32.mrf.mxu1 }
 0x1b9   :  { %v423_v15 = vmax.f32 %v419_v11, 0.0  ;;  %v404_v16 = vadd.f32 %v403_v14, %v326_v13  ;;  %v420_v18 = vadd.f32 %v411_v3, %v402_v12 }
 0x1bb   :  { %v421_v19 = vadd.f32 %v415_v5, %v404_v16  ;;  %529 = vmatprep.mubr.f32.mxu0 %v423_v15  ;;  %v424_v20 = vmax.f32 %v420_v18, 0.0 }
 0x1bc   :  { %530 = vmatmul.mubr.f32.vlgmr.msra.gmra.mxu0 %v422_v17 }
 0x1bd   :  { %v425_v0 = vmax.f32 %v421_v19, 0.0 }
 0x1bf   :  { %534 = vmatprep.mubr.f32.mxu0 %v425_v0 }
 0x1c0   :  { %535 = vmatmul.mubr.f32.gmra.mxu0 %v424_v20 }
 0x27c   :  { %v585_v21 = vpop.f32.mrf.mxu0 }
 0x27e   :  { %v586_v23 = vpop.f32.mrf.mxu0 }
 0x27f   :  { %v587_v24 = vadd.f32 %v586_v23, %v585_v21 }
 0x280   :  { %v588_v25 = vpop.f32.mrf.mxu0 }
 0x281   :  { %v532_v26 = vadd.f32 %v587_v24, %v552_v22 }
 0x282   :  { %v589_v27 = vpop.f32.mrf.mxu0 }
 0x283   :  { %540 = vst [vmem:[%s787_s9] sm:$0xff] %v532_v26  ;;  %v590_v28 = vadd.f32 %v589_v27, %v588_v25 }
 0x285   :  { %v537_v29 = vadd.f32 %v590_v28, %v552_v22 }
 0x287   :  { %541 = vst [vmem:[%s787_s9 + $0x8] sm:$0xff] %v537_v29 }
 0x288   :  { %546 = vsyncpa [#allocation3], 1 }
 0x289   :  { %547 = vsyncpa [#allocation5], 1 }

</bundles_post_ra>
